<compile_context>
chip_gen: v7x
topology: tpu7x:2x2x1
jax: 0.10.0
libtpu: 0.0.40
codegen_flags: <defaults>
</compile_context>

<pallas_src>
import math

import jax
import jax.numpy as jnp
from jax import lax
from jax.experimental import pallas as pl
from jax.experimental.pallas import tpu as pltpu


def mlp_kernel(x_ref, w1_ref, b1_ref, w2_ref, b2_ref, w3_ref, b3_ref, ot_ref):
    """Transposed-layout MLP tile (batch on the 128-wide lane axis).

    x_ref  : (TB, D)      f32   input activations in natural layout
    wK_ref : (outK, inK)  bf16  weights in PyTorch (out, in) layout
    bK_ref : (outK, 1)    f32   biases (padded b3 rows are -1e9)
    ot_ref : (O_pad, TB)  f32   softmax probabilities, lane-dense store
    """
    xb = x_ref[...].astype(jnp.bfloat16)                               # (TB, D)

    # hidden1 + ReLU   (dropout1 is identity at inference)
    # h1^T = W1 @ x^T via dot_general contracting both feature axes (no explicit
    # transpose materialized in VMEM).
    h1 = lax.dot_general(w1_ref[...], xb, (((1,), (1,)), ((), ())),
                         preferred_element_type=jnp.float32) + b1_ref[...]
    h1 = jnp.maximum(h1, 0.0).astype(jnp.bfloat16)                     # (H1, TB)

    # hidden2 + ReLU   (dropout2 is identity at inference)
    h2 = jnp.dot(w2_ref[...], h1, preferred_element_type=jnp.float32) + b2_ref[...]
    h2 = jnp.maximum(h2, 0.0).astype(jnp.bfloat16)                     # (H2, TB)

    # hidden3 + Softmax over the class axis (PyTorch dim=1 == sublane axis here).
    logits = jnp.dot(w3_ref[...], h2, preferred_element_type=jnp.float32) + b3_ref[...]
    m = jnp.max(logits, axis=0, keepdims=True)                         # (1, TB)
    e = jnp.exp(logits - m)                                            # (O_pad, TB); padded rows -> 0
    s = jnp.sum(e, axis=0, keepdims=True)                              # (1, TB)
    ot_ref[...] = (e / s).astype(ot_ref.dtype)                         # exact normalization


def net_forward(x, params, *, tb=None):
    """Pallas forward pass. x: (B, n_inputs) float32 -> (B, n_outputs) float32."""
    w1, b1, w2, b2, w3, b3 = params
    B, D = x.shape
    H1, H2, O = w1.shape[0], w2.shape[0], w3.shape[0]

    # Batch padded to a lane multiple; single grid step by default (capped at 1024
    # lanes per step to bound f32 intermediate vreg pressure).
    B_pad = ((B + 127) // 128) * 128
    if tb is None:
        tb = min(B_pad, 1024)
    assert tb % 128 == 0, "batch tile must be a multiple of 128 (lane width)"
    B_pad = ((B_pad + tb - 1) // tb) * tb
    xp = x if B_pad == B else jnp.pad(x, ((0, B_pad - B), (0, 0)))

    # bf16 matmul operands (weights are tiny; cast once here).
    w1b = w1.astype(jnp.bfloat16)
    w2b = w2.astype(jnp.bfloat16)
    w3b = w3.astype(jnp.bfloat16)

    # Pad class dim to a full sublane group (unmasked output stores).  Padded
    # logit rows get bias -1e9 so exp() underflows to 0 and softmax is unchanged.
    O_pad = ((O + 7) // 8) * 8
    w3p = jnp.zeros((O_pad, H2), jnp.bfloat16).at[:O].set(w3b)
    b3p = jnp.full((O_pad, 1), -1e9, jnp.float32).at[:O].set(b3)

    nb = B_pad // tb
    full = lambda i: (0, 0)   # weights/biases: same resident block every step

    flops = 2 * B_pad * (D * H1 + H1 * H2 + H2 * O_pad)
    bytes_accessed = (xp.size * 4 + O_pad * B_pad * 4
                      + (w1b.size + w2b.size + w3p.size) * 2
                      + (b1.size + b2.size + b3p.size) * 4)

    out_t = pl.pallas_call(
        mlp_kernel,
        out_shape=jax.ShapeDtypeStruct((O_pad, B_pad), jnp.float32),
        grid_spec=pl.GridSpec(
            grid=(nb,),
            in_specs=[
                pl.BlockSpec((tb, D), lambda i: (i, 0)),   # x tile (natural layout)
                pl.BlockSpec((H1, D), full),               # W1 (out, in)
                pl.BlockSpec((H1, 1), full),               # b1
                pl.BlockSpec((H2, H1), full),              # W2
                pl.BlockSpec((H2, 1), full),               # b2
                pl.BlockSpec((O_pad, H2), full),           # W3 (class-padded)
                pl.BlockSpec((O_pad, 1), full),            # b3 (class-padded)
            ],
            out_specs=pl.BlockSpec((O_pad, tb), lambda i: (0, i)),  # lane-dense output
        ),
        compiler_params=pltpu.CompilerParams(
            dimension_semantics=("parallel",)),
        cost_estimate=pl.CostEstimate(
            flops=flops,
            transcendentals=B_pad * O_pad,
            bytes_accessed=bytes_accessed),
    )(xp, w1b, b1, w2b, b2, w3p, b3p)

    # Only the final relayout stays outside the kernel.
    return out_t[:O, :B].T                                             # (B, O)


def init_params(key, n_inputs, n_outputs):
    """Deterministic init mirroring the PyTorch module. Weights stored in the
    native torch (out_features, in_features) layout; biases as (out_features, 1)."""
    h1, h2 = n_inputs * 2, n_outputs * 2
    ks = jax.random.split(key, 6)

    def kaiming_uniform(k, out_f, in_f):          # gain=sqrt(2) relu kaiming uniform
        bound = math.sqrt(6.0 / in_f)
        return jax.random.uniform(k, (out_f, in_f), jnp.float32, -bound, bound)

    def xavier_uniform(k, out_f, in_f):
        bound = math.sqrt(6.0 / (in_f + out_f))
        return jax.random.uniform(k, (out_f, in_f), jnp.float32, -bound, bound)

    def bias_uniform(k, out_f, in_f):             # torch Linear default bias init
        bound = 1.0 / math.sqrt(in_f)
        return jax.random.uniform(k, (out_f, 1), jnp.float32, -bound, bound)

    w1 = kaiming_uniform(ks[0], h1, n_inputs)
    b1 = bias_uniform(ks[1], h1, n_inputs)
    w2 = kaiming_uniform(ks[2], h2, h1)
    b2 = bias_uniform(ks[3], h2, h1)
    w3 = xavier_uniform(ks[4], n_outputs, h2)
    b3 = bias_uniform(ks[5], n_outputs, h2)
    return (w1, b1, w2, b2, w3, b3)


def net_forward_ref(x, params):
    """Pure-JAX reference mirroring the kernel's math (bf16 operands, f32 accum)."""
    w1, b1, w2, b2, w3, b3 = params
    xb = x.astype(jnp.bfloat16)
    w1b, w2b, w3b = (w.astype(jnp.bfloat16) for w in (w1, w2, w3))
    h1 = jnp.maximum(
        jnp.dot(xb, w1b.T, preferred_element_type=jnp.float32) + b1.T, 0.0
    ).astype(jnp.bfloat16)
    h2 = jnp.maximum(
        jnp.dot(h1, w2b.T, preferred_element_type=jnp.float32) + b2.T, 0.0
    ).astype(jnp.bfloat16)
    logits = jnp.dot(h2, w3b.T, preferred_element_type=jnp.float32) + b3.T
    return jax.nn.softmax(logits, axis=1)


if __name__ == "__main__":
    # TODO(synk): dropout (p=0.3) is modeled as identity (inference/eval mode);
    # training-mode Bernoulli masking would use pltpu.prng_* inside the kernel.
    B, n_inputs, n_outputs = 256, 16, 4
    key = jax.random.PRNGKey(0)
    k_x, k_p = jax.random.split(key)
    x = jax.random.normal(k_x, (B, n_inputs), dtype=jnp.float32)
    params = init_params(k_p, n_inputs, n_outputs)

    out = net_forward(x, params)                  # single grid step (tb = B_pad)
    out = jax.block_until_ready(out)

    ref = net_forward_ref(x, params)
    assert out.shape == (B, n_outputs)
    assert jnp.allclose(out, ref, atol=2e-3, rtol=2e-3), "mismatch vs reference"
    assert jnp.allclose(jnp.sum(out, axis=1), 1.0, atol=1e-4), "softmax rows must sum to 1"
    print("KERNEL_OK")
</pallas_src>

<mosaic_0001>
module attributes {stable_mosaic.version = 11 : i64} {
  func.func @mlp_kernel(%arg0: i32, %arg1: memref<256x16xf32, #tpu.memory_space<vmem>>, %arg2: memref<32x16xbf16, #tpu.memory_space<vmem>>, %arg3: memref<32x1xf32, #tpu.memory_space<vmem>>, %arg4: memref<8x32xbf16, #tpu.memory_space<vmem>>, %arg5: memref<8x1xf32, #tpu.memory_space<vmem>>, %arg6: memref<8x8xbf16, #tpu.memory_space<vmem>>, %arg7: memref<8x1xf32, #tpu.memory_space<vmem>>, %arg8: memref<8x256xf32, #tpu.memory_space<vmem>>) attributes {dimension_semantics = [#tpu.dimension_semantics<parallel>], iteration_bounds = array<i64: 1>, scalar_prefetch = 0 : i64, scratch_operands = 0 : i64, tpu.core_type = #tpu.core_type<tc>, window_params = [{transform_indices = @transform_0, window_bounds = array<i64: 256, 16>}, {pipeline_mode = #tpu.pipeline_mode<synchronous>, transform_indices = @transform_1, window_bounds = array<i64: 32, 16>}, {pipeline_mode = #tpu.pipeline_mode<synchronous>, transform_indices = @transform_2, window_bounds = array<i64: 32, 1>}, {pipeline_mode = #tpu.pipeline_mode<synchronous>, transform_indices = @transform_3, window_bounds = array<i64: 8, 32>}, {pipeline_mode = #tpu.pipeline_mode<synchronous>, transform_indices = @transform_4, window_bounds = array<i64: 8, 1>}, {pipeline_mode = #tpu.pipeline_mode<synchronous>, transform_indices = @transform_5, window_bounds = array<i64: 8, 8>}, {pipeline_mode = #tpu.pipeline_mode<synchronous>, transform_indices = @transform_6, window_bounds = array<i64: 8, 1>}, {transform_indices = @transform_7, window_bounds = array<i64: 8, 256>}]} {
    %c0 = arith.constant 0 : index
    %c0_0 = arith.constant 0 : index
    %0 = vector.load %arg1[%c0, %c0_0] : memref<256x16xf32, #tpu.memory_space<vmem>>, vector<256x16xf32>
    %1 = arith.truncf %0 : vector<256x16xf32> to vector<256x16xbf16>
    %c0_1 = arith.constant 0 : index
    %c0_2 = arith.constant 0 : index
    %2 = vector.load %arg2[%c0_1, %c0_2] : memref<32x16xbf16, #tpu.memory_space<vmem>>, vector<32x16xbf16>
    %cst = arith.constant dense<0.000000e+00> : vector<32x256xf32>
    %3 = tpu.matmul %2, %1, %cst {dimension_numbers = #tpu.dot_dimension_numbers<[1], [1], [0], [0], [0, 0, 1, 0], [], []>} : vector<32x16xbf16>, vector<256x16xbf16>, vector<32x256xf32> -> vector<32x256xf32>
    %c0_3 = arith.constant 0 : index
    %c0_4 = arith.constant 0 : index
    %4 = vector.load %arg3[%c0_3, %c0_4] : memref<32x1xf32, #tpu.memory_space<vmem>>, vector<32x1xf32>
    %5 = vector.broadcast %4 : vector<32x1xf32> to vector<32x256xf32>
    %6 = arith.addf %3, %5 : vector<32x256xf32>
    %cst_5 = arith.constant 0.000000e+00 : f32
    %7 = vector.broadcast %cst_5 : f32 to vector<32x256xf32>
    %8 = arith.maximumf %6, %7 : vector<32x256xf32>
    %9 = arith.truncf %8 : vector<32x256xf32> to vector<32x256xbf16>
    %c0_6 = arith.constant 0 : index
    %c0_7 = arith.constant 0 : index
    %10 = vector.load %arg4[%c0_6, %c0_7] : memref<8x32xbf16, #tpu.memory_space<vmem>>, vector<8x32xbf16>
    %cst_8 = arith.constant dense<0.000000e+00> : vector<8x256xf32>
    %11 = tpu.matmul %10, %9, %cst_8 {dimension_numbers = #tpu.dot_dimension_numbers<[1], [0], [0], [1], [0, 0, 1, 1], [], []>} : vector<8x32xbf16>, vector<32x256xbf16>, vector<8x256xf32> -> vector<8x256xf32>
    %c0_9 = arith.constant 0 : index
    %c0_10 = arith.constant 0 : index
    %12 = vector.load %arg5[%c0_9, %c0_10] : memref<8x1xf32, #tpu.memory_space<vmem>>, vector<8x1xf32>
    %13 = vector.broadcast %12 : vector<8x1xf32> to vector<8x256xf32>
    %14 = arith.addf %11, %13 : vector<8x256xf32>
    %cst_11 = arith.constant 0.000000e+00 : f32
    %15 = vector.broadcast %cst_11 : f32 to vector<8x256xf32>
    %16 = arith.maximumf %14, %15 : vector<8x256xf32>
    %17 = arith.truncf %16 : vector<8x256xf32> to vector<8x256xbf16>
    %c0_12 = arith.constant 0 : index
    %c0_13 = arith.constant 0 : index
    %18 = vector.load %arg6[%c0_12, %c0_13] : memref<8x8xbf16, #tpu.memory_space<vmem>>, vector<8x8xbf16>
    %cst_14 = arith.constant dense<0.000000e+00> : vector<8x256xf32>
    %19 = tpu.matmul %18, %17, %cst_14 {dimension_numbers = #tpu.dot_dimension_numbers<[1], [0], [0], [1], [0, 0, 1, 1], [], []>} : vector<8x8xbf16>, vector<8x256xbf16>, vector<8x256xf32> -> vector<8x256xf32>
    %c0_15 = arith.constant 0 : index
    %c0_16 = arith.constant 0 : index
    %20 = vector.load %arg7[%c0_15, %c0_16] : memref<8x1xf32, #tpu.memory_space<vmem>>, vector<8x1xf32>
    %21 = vector.broadcast %20 : vector<8x1xf32> to vector<8x256xf32>
    %22 = arith.addf %19, %21 : vector<8x256xf32>
    %cst_17 = arith.constant dense<0xFF800000> : vector<256xf32>
    %23 = vector.multi_reduction <maximumf>, %22, %cst_17 [0] : vector<8x256xf32> to vector<256xf32>
    %24 = vector.shape_cast %23 : vector<256xf32> to vector<1x256xf32>
    %25 = vector.broadcast %24 : vector<1x256xf32> to vector<8x256xf32>
    %26 = arith.subf %22, %25 : vector<8x256xf32>
    %27 = math.exp %26 : vector<8x256xf32>
    %cst_18 = arith.constant dense<0.000000e+00> : vector<256xf32>
    %28 = vector.multi_reduction <add>, %27, %cst_18 [0] : vector<8x256xf32> to vector<256xf32>
    %29 = vector.shape_cast %28 : vector<256xf32> to vector<1x256xf32>
    %30 = vector.broadcast %29 : vector<1x256xf32> to vector<8x256xf32>
    %31 = arith.divf %27, %30 : vector<8x256xf32>
    %c0_19 = arith.constant 0 : index
    %c0_20 = arith.constant 0 : index
    %32 = vector.load %arg8[%c0_19, %c0_20] : memref<8x256xf32, #tpu.memory_space<vmem>>, vector<8x256xf32>
    tpu.vector_store %arg8[%c0_19, %c0_20], %31 {strides = array<i32>} : memref<8x256xf32, #tpu.memory_space<vmem>>, vector<8x256xf32>,
    return
  }
  func.func @transform_0(%arg0: i32) -> (i32, i32) {
    %c0_i32 = arith.constant 0 : i32
    %c0_i32_0 = arith.constant 0 : i32
    return %arg0, %c0_i32 : i32, i32
  }
  func.func @transform_1(%arg0: i32) -> (i32, i32) {
    %c0_i32 = arith.constant 0 : i32
    %c0_i32_0 = arith.constant 0 : i32
    %c0_i32_1 = arith.constant 0 : i32
    return %c0_i32, %c0_i32_0 : i32, i32
  }
  func.func @transform_2(%arg0: i32) -> (i32, i32) {
    %c0_i32 = arith.constant 0 : i32
    %c0_i32_0 = arith.constant 0 : i32
    %c0_i32_1 = arith.constant 0 : i32
    return %c0_i32, %c0_i32_0 : i32, i32
  }
  func.func @transform_3(%arg0: i32) -> (i32, i32) {
    %c0_i32 = arith.constant 0 : i32
    %c0_i32_0 = arith.constant 0 : i32
    %c0_i32_1 = arith.constant 0 : i32
    return %c0_i32, %c0_i32_0 : i32, i32
  }
  func.func @transform_4(%arg0: i32) -> (i32, i32) {
    %c0_i32 = arith.constant 0 : i32
    %c0_i32_0 = arith.constant 0 : i32
    %c0_i32_1 = arith.constant 0 : i32
    return %c0_i32, %c0_i32_0 : i32, i32
  }
  func.func @transform_5(%arg0: i32) -> (i32, i32) {
    %c0_i32 = arith.constant 0 : i32
    %c0_i32_0 = arith.constant 0 : i32
    %c0_i32_1 = arith.constant 0 : i32
    return %c0_i32, %c0_i32_0 : i32, i32
  }
  func.func @transform_6(%arg0: i32) -> (i32, i32) {
    %c0_i32 = arith.constant 0 : i32
    %c0_i32_0 = arith.constant 0 : i32
    %c0_i32_1 = arith.constant 0 : i32
    return %c0_i32, %c0_i32_0 : i32, i32
  }
  func.func @transform_7(%arg0: i32) -> (i32, i32) {
    %c0_i32 = arith.constant 0 : i32
    %c0_i32_0 = arith.constant 0 : i32
    return %c0_i32, %arg0 : i32, i32
  }
}

</mosaic_0001>

<bundles_post_ra>
// kernel: tpu_custom_call.1
= control target key start
LH: loop header
LB: loop body
LE: loop exit
PB: predicated region body
PF: predicated region fallthrough
CT: control target
= control target key end

     0   :  { %vm114_vm0 = vcmask 130048   ;;  %v472_v7 = vmov 0   ;;  %s680_s0 = inlined_call_operand.vmem [shape: f32[256,16], index: 0, kind: input, shape index: {}]   ;;  %s681_s1 = inlined_call_operand.vmem [shape: bf16[32,16], index: 1, kind: input, shape index: {}]   ;;  %s682_s2 = inlined_call_operand.vmem [shape: f32[32,1], index: 2, kind: input, shape index: {}]   ;;  %s683_s3 = inlined_call_operand.vmem [shape: bf16[8,32], index: 3, kind: input, shape index: {}]   ;;  %s684_s4 = inlined_call_operand.vmem [shape: f32[8,1], index: 4, kind: input, shape index: {}]   ;;  %s685_s5 = inlined_call_operand.vmem [shape: bf16[8,8], index: 5, kind: input, shape index: {}]   ;;  %s686_s6 = inlined_call_operand.vmem [shape: f32[8,1], index: 6, kind: input, shape index: {}]   ;;  %s687_s7 = inlined_call_operand.hbm [shape: f32[8,256], index: 7, kind: output, shape index: {}]  }
   0x1   :  { %v44_v0 = vld [vmem:[%s680_s0 + $0x80] sm:$0xff]  ;;  %v45_v1 = vld [vmem:[%s680_s0 + $0x88] sm:$0xff]  ;;  %v46_v5 = vld [vmem:[%s680_s0 + $0x90] sm:$0xff]  ;;  %436 = vset.pattern.permute.xlu0 %v472_v7  ;;  %437 = vset.pattern.permute.xlu1 %v472_v7 }
   0x2   :  { %v28_v2 = vld [vmem:[%s680_s0] sm:$0xff]  ;;  %v68_v3 = vpack.c.bf16 %v45_v1, %v44_v0  ;;  %v29_v4 = vld [vmem:[%s680_s0 + $0x8] sm:$0xff]  ;;  %v47_v6 = vld [vmem:[%s680_s0 + $0x98] sm:$0xff]  ;;  %277 = vmatprep.mubr.bf16.mxu1 %v472_v7 }
   0x3   :  { %v60_v8 = vpack.c.bf16 %v29_v4, %v28_v2  ;;  %v69_v9 = vpack.c.bf16 %v47_v6, %v46_v5  ;;  %v30_v10 = vld [vmem:[%s680_s0 + $0x10] sm:$0xff]  ;;  %v31_v11 = vld [vmem:[%s680_s0 + $0x18] sm:$0xff]  ;;  %v48_v14 = vld [vmem:[%s680_s0 + $0xa0] sm:$0xff] }
   0x4   :  { %426 = vmatprep.subr.msk.bf16.mxu0 %vm114_vm0, %v68_v3  ;;  %v61_v13 = vpack.c.bf16 %v31_v11, %v30_v10  ;;  %v49_v15 = vld [vmem:[%s680_s0 + $0xa8] sm:$0xff]  ;;  %v32_v18 = vld [vmem:[%s680_s0 + $0x20] sm:$0xff]  ;;  %v82_v22 = vld [vmem:[%s682_s2 + $0x10] sm:$0xff] }
   0x5   :  { %v122_v12 = vsel %vm114_vm0, %v60_v8, 0  ;;  %v70_v17 = vpack.c.bf16 %v49_v15, %v48_v14  ;;  %v33_v19 = vld [vmem:[%s680_s0 + $0x28] sm:$0xff]  ;;  %v560_v20 = vld [vmem:[%s681_s1] sm:$0xff]  }
   0x6   :  { %407 = vmatpush3.bf16.xpose.msra.mxu0 %v122_v12  ;;  %v125_v16 = vsel %vm114_vm0, %v61_v13, 0  ;;  %v80_v21 = vld [vmem:[%s682_s2] sm:$0xff]  ;;  %422 = vmatprep.mubr.msk.bf16.mxu0 %vm114_vm0, %v560_v20  ;;  %v62_v23 = vpack.c.bf16 %v33_v19, %v32_v18 }
   0x7   :  { %427 = vmatprep.subr.msk.bf16.mxu0 %vm114_vm0, %v69_v9  ;;  %86 = vperm.xlu0 %436, %v80_v21  }
   0xe   :  { %409 = vmatpush3.bf16.xpose.msra.mxu0 %v125_v16 }
   0xf   :  { %428 = vmatprep.subr.msk.bf16.mxu0 %vm114_vm0, %v70_v17 }
  0x10   :  { %12 = vsyncpa [#allocation3], 0  ;;  %v50_v24 = vld [vmem:[%s680_s0 + $0xb0] sm:$0xff]  ;;  %v51_v25 = vld [vmem:[%s680_s0 + $0xb8] sm:$0xff]  ;;  %96 = vperm.xlu1 %437, %v82_v22   ;;  %v128_v28 = vsel %vm114_vm0, %v62_v23, 0  ;;  %vm241_vm1 = vcmask 261120  }
  0x11   :  { %v81_v26 = vld [vmem:[%s682_s2 + $0x8] sm:$0xff]  ;;  %v83_v27 = vld [vmem:[%s682_s2 + $0x18] sm:$0xff]  ;;  %v71_v29 = vpack.c.bf16 %v51_v25, %v50_v24  ;;  %v34_v30 = vld [vmem:[%s680_s0 + $0x30] sm:$0xff]  ;;  %vm301_vm2 = vcmask 1043456   ;;  %vm297_vm3 = vcmask 64512  }
  0x12   :  { %91 = vperm.xlu0 %436, %v81_v26   ;;  %v35_v31 = vld [vmem:[%s680_s0 + $0x38] sm:$0xff]  ;;  %v235_v32 = vld [vmem:[%s684_s4] sm:$0xff]  ;;  %v53_v36 = vld [vmem:[%s680_s0 + $0xc8] sm:$0xff] }
  0x13   :  { %v291_v33 = vld [vmem:[%s686_s6] sm:$0xff]  ;;  %v63_v34 = vpack.c.bf16 %v35_v31, %v34_v30  ;;  %v37_v40 = vld [vmem:[%s680_s0 + $0x48] sm:$0xff]  ;;  %v54_v42 = vld [vmem:[%s680_s0 + $0xd0] sm:$0xff] }
  0x14   :  { %101 = vperm.xlu1 %437, %v83_v27   ;;  %v52_v35 = vld [vmem:[%s680_s0 + $0xc0] sm:$0xff]  ;;  %v55_v43 = vld [vmem:[%s680_s0 + $0xd8] sm:$0xff]  ;;  %v38_v46 = vld [vmem:[%s680_s0 + $0x50] sm:$0xff] }
  0x15   :  { %v131_v37 = vsel %vm114_vm0, %v63_v34, 0  ;;  %v72_v38 = vpack.c.bf16 %v53_v36, %v52_v35  ;;  %v36_v39 = vld [vmem:[%s680_s0 + $0x40] sm:$0xff]  ;;  %v73_v45 = vpack.c.bf16 %v55_v43, %v54_v42  ;;  %v39_v47 = vld [vmem:[%s680_s0 + $0x58] sm:$0xff]  ;;  %v57_v50 = vld [vmem:[%s680_s0 + $0xe8] sm:$0xff] }
  0x16   :  { %411 = vmatpush3.bf16.xpose.msra.mxu0 %v128_v28  ;;  %238 = vperm.xlu0 %436, %v235_v32   ;;  %v64_v41 = vpack.c.bf16 %v37_v40, %v36_v39  ;;  %v65_v48 = vpack.c.bf16 %v39_v47, %v38_v46  ;;  %v56_v49 = vld [vmem:[%s680_s0 + $0xe0] sm:$0xff]  ;;  %v41_v54 = vld [vmem:[%s680_s0 + $0x68] sm:$0xff]  ;;  %v58_v56 = vld [vmem:[%s680_s0 + $0xf0] sm:$0xff] }
  0x17   :  { %429 = vmatprep.subr.msk.bf16.mxu0 %vm114_vm0, %v71_v29  ;;  %v74_v52 = vpack.c.bf16 %v57_v50, %v56_v49  ;;  %v40_v53 = vld [vmem:[%s680_s0 + $0x60] sm:$0xff]  ;;  %v59_v57 = vld [vmem:[%s680_s0 + $0xf8] sm:$0xff]  ;;  %v42_v60 = vld [vmem:[%s680_s0 + $0x70] sm:$0xff] }
  0x18   :  { %294 = vperm.xlu1 %437, %v291_v33   ;;  %v134_v44 = vsel %vm114_vm0, %v64_v41, 0  ;;  %v137_v51 = vsel %vm114_vm0, %v65_v48, 0  ;;  %v66_v55 = vpack.c.bf16 %v41_v54, %v40_v53  ;;  %v75_v59 = vpack.c.bf16 %v59_v57, %v58_v56  ;;  %v43_v61 = vld [vmem:[%s680_s0 + $0x78] sm:$0xff]  ;;  %v439_v0 = vld [vmem:[%s681_s1 + $0x8] sm:$0xff]   ;;  %v234_v34 = vld [vmem:[%s683_s3] sm:$0xf] }
  0x19   :  { %v67_v62 = vpack.c.bf16 %v43_v61, %v42_v60  ;;  %v290_v47 = vld [vmem:[%s685_s5] sm:$0xf]  ;;  %s473_s5 = smov [#allocation2]  }
  0x1a   :  { %v140_v58 = vsel %vm114_vm0, %v66_v55, 0  ;;  %s391_s30 = sshll.u32 %s473_s5, 4  ;;  %s392_s30 = int_to_ptr.vmem [resolvable:$true] %s391_s30 }
  0x1b   :  { %v143_v63 = vsel %vm114_vm0, %v67_v62, 0  ;;  %s448_s8 = scalar_lea.vmem %s392_s30, 256  ;;  %p453_p1 = scmp.lt.s32.totalorder %s392_s30, %s392_s30 }
  0x1c   :  { %p449_p0 = scmp.ne.s32.totalorder %s392_s30, %s448_s8  ;;  %p454_p2 = scmp.lt.s32.totalorder %s448_s8, %s448_s8 }
  0x1e   :  { %413 = vmatpush3.bf16.xpose.msra.mxu0 %v131_v37  ;;  %p455_p3 = por %p454_p2, %p453_p1 }
  0x1f   :  { %430 = vmatprep.subr.msk.bf16.mxu0 %vm114_vm0, %v72_v38 }
  0x20   :  { %p456_p4 = pnand %p455_p3, %p449_p0 }
  0x26   :  { %415 = vmatpush3.bf16.xpose.msra.mxu0 %v134_v44 }
  0x27   :  { %431 = vmatprep.subr.msk.bf16.mxu0 %vm114_vm0, %v73_v45 }
  0x2e   :  { %417 = vmatpush3.bf16.xpose.msra.mxu0 %v137_v51 }
  0x2f   :  { %432 = vmatprep.subr.msk.bf16.mxu0 %vm114_vm0, %v74_v52 }
  0x36   :  { %419 = vmatpush3.bf16.xpose.msra.mxu0 %v140_v58 }
  0x37   :  { %433 = vmatprep.subr.msk.bf16.mxu0 %vm114_vm0, %v75_v59 }
  0x3e   :  { %421 = vmatpush3.bf16.xpose.msra.mxu0 %v143_v63 }
  0x45   :  { %423 = vmatmul.mubr.msk.bf16.vlgmr.msra.gmra.mrb[0].mxu0 %vm114_vm0, %v560_v20 }
  0x46   :  { %424 = vmatprep.mubr.msk.bf16.mxu0 %vm114_vm0, %v439_v0 }
  0x4d   :  { %425 = vmatmul.mubr.msk.bf16.gmra.mrb[4].mxu0 %vm114_vm0, %v439_v0 }
  0x86   :  { %v87_v1 = vpop.permute.xlu0 %86 }
  0x8f   :  { %v97_v11 = vpop.permute.xlu1 %96 }
  0x91   :  { %v92_v5 = vpop.permute.xlu0 %91 }
  0x93   :  { %v102_v22 = vpop.permute.xlu1 %101 }
  0x95   :  { %v239_v35 = vpop.permute.xlu0 %238 }
 0x118   :  { %v203_v2 = vpop.f32.mrb[0].mxu0 }
 0x119   :  { %v204_v3 = vadd.f32 %v203_v2, %v87_v1  ;;  %v205_v4 = vpop.f32.mrb[1].mxu0 }
 0x11a   :  { %v206_v6 = vadd.f32 %v205_v4, %v87_v1  ;;  %v207_v8 = vpop.f32.mrb[2].mxu0 }
 0x11b   :  { %v208_v9 = vadd.f32 %v207_v8, %v92_v5  ;;  %v209_v10 = vpop.f32.mrb[3].mxu0  ;;  %v222_v13 = vmax.f32 %v204_v3, 0.0 }
 0x11c   :  { %v210_v12 = vadd.f32 %v209_v10, %v92_v5  ;;  %v223_v15 = vmax.f32 %v206_v6, 0.0 }
 0x11d   :  { %v224_v14 = vmax.f32 %v208_v9, 0.0 }
 0x11e   :  { %v225_v16 = vmax.f32 %v210_v12, 0.0 }
 0x11f   :  { %v230_v17 = vpack.c.bf16 %v224_v14, %v222_v13 }
 0x120   :  { %v213_v18 = vpop.f32.mrb[4].mxu0  ;;  %v231_v19 = vpack.c.bf16 %v225_v16, %v223_v15 }
 0x121   :  { %v214_v20 = vadd.f32 %v213_v18, %v97_v11  ;;  %v215_v21 = vpop.f32.mrb[5].mxu0 }
 0x122   :  { %v216_v23 = vadd.f32 %v215_v21, %v97_v11  ;;  %v217_v24 = vpop.f32.mrb[6].mxu0  ;;  %245 = vmatprep.subr.bf16.mxu1 %v231_v19 }
 0x123   :  { %v218_v25 = vadd.f32 %v217_v24, %v102_v22  ;;  %v219_v26 = vpop.f32.mrb[7].mxu0  ;;  %246 = vmatpush1.bf16.msra.mxu1 %v230_v17  ;;  %v226_v28 = vmax.f32 %v214_v20, 0.0 }
 0x124   :  { %v220_v27 = vadd.f32 %v219_v26, %v102_v22  ;;  %v227_v30 = vmax.f32 %v216_v23, 0.0 }
 0x125   :  { %v228_v29 = vmax.f32 %v218_v25, 0.0 }
 0x126   :  { %v229_v31 = vmax.f32 %v220_v27, 0.0 }
 0x127   :  { %v232_v32 = vpack.c.bf16 %v228_v29, %v226_v28 }
 0x128   :  { %v233_v33 = vpack.c.bf16 %v229_v31, %v227_v30 }
 0x12a   :  { %247 = vmatprep.subr.bf16.mxu1 %v233_v33 }
 0x12b   :  { %248 = vmatpush1.bf16.msra.mxu1 %v232_v32 }
 0x12e   :  { %403 = vmatmul.mubr.msk.bf16.vlgmr.msra.gmra.mrb[0].mxu1 %vm241_vm1, %v234_v34 }
 0x12f   :  { %340 = vmatprep.mubr.bf16.mxu1 %v472_v7  ;;  %v295_v7 = vpop.permute.xlu1 %294 }
 0x201   :  { %v279_v36 = vpop.f32.mrb[0].mxu1 }
 0x202   :  { %v280_v37 = vadd.f32 %v279_v36, %v239_v35  ;;  %v281_v38 = vpop.f32.mrb[1].mxu1 }
 0x203   :  { %v282_v39 = vadd.f32 %v281_v38, %v239_v35  ;;  %v283_v40 = vpop.f32.mrb[2].mxu1 }
 0x204   :  { %v286_v41 = vmax.f32 %v280_v37, 0.0  ;;  %v284_v42 = vpop.f32.mrb[3].mxu1 }
 0x205   :  { %v287_v43 = vmax.f32 %v282_v39, 0.0 }
 0x206   :  { %v288_v44 = vpack.c.bf16 %v286_v41, %v286_v41 }
 0x207   :  { %v289_v45 = vpack.c.bf16 %v287_v43, %v287_v43 }
 0x208   :  { %v303_v46 = vsel %vm301_vm2, %v288_v44, 0 }
 0x209   :  { %404 = vmatprep.subr.msk.bf16.mxu1 %vm301_vm2, %v289_v45 }
 0x20a   :  { %309 = vmatpush1.bf16.msra.mxu1 %v303_v46 }
 0x20d   :  { %405 = vmatmul.mubr.msk.bf16.vlgmr.msra.gmra.mrb[4].mxu1 %vm297_vm3, %v290_v47 }
 0x2e0   :  { %v342_v48 = vpop.f32.mrb[4].mxu1 }
 0x2e1   :  { %v343_v49 = vadd.f32 %v342_v48, %v295_v7  ;;  %v344_v50 = vpop.f32.mrb[5].mxu1 }
 0x2e2   :  { %v345_v51 = vadd.f32 %v344_v50, %v295_v7  ;;  %v346_v52 = vpop.f32.mrb[6].mxu1 }
 0x2e3   :  { %v349_v53 = vrot.slane %v343_v49, 4  ;;  %v347_v54 = vpop.f32.mrb[7].mxu1 }
 0x2e4   :  { %v355_v55 = vrot.slane %v345_v51, 4 }
 0x2e5   :  { %v350_v56 = vmax.f32 %v343_v49, %v349_v53 }
 0x2e6   :  { %v356_v57 = vmax.f32 %v345_v51, %v355_v55 }
 0x2e7   :  { %v351_v58 = vrot.slane %v350_v56, 2 }
 0x2e8   :  { %v357_v59 = vrot.slane %v356_v57, 2 }
 0x2e9   :  { %v352_v60 = vmax.f32 %v350_v56, %v351_v58 }
 0x2ea   :  { %v358_v61 = vmax.f32 %v356_v57, %v357_v59 }
 0x2eb   :  { %v353_v62 = vrot.slane %v352_v60, 1 }
 0x2ec   :  { %v359_v63 = vrot.slane %v358_v61, 1 }
 0x2ed   :  { %v354_v0 = vmax.f32 %v352_v60, %v353_v62 }
 0x2ee   :  { %v360_v1 = vmax.f32 %v358_v61, %v359_v63 }
 0x2ef   :  { %v361_v2 = vsub.f32 %v343_v49, %v354_v0 }
 0x2f0   :  { %v362_v3 = vsub.f32 %v345_v51, %v360_v1 }
 0x2f1   :  { %v363_v4 = vmul.f32 1.442695, %v361_v2 }
 0x2f2   :  { %v365_v5 = vmul.f32 1.442695, %v362_v3 }
 0x2f3   :  { %440 = vpow2.f32 %v363_v4 }
 0x2f4   :  { %442 = vpow2.f32 %v365_v5 }
 0x2fd   :  { %v441_v6 = vpop.eup %440 }
 0x2fe   :  { %v443_v8 = vpop.eup %442  ;;  %v367_v9 = vrot.slane %v441_v6, 4 }
 0x2ff   :  { %v373_v10 = vrot.slane %v443_v8, 4 }
 0x300   :  { %v368_v11 = vadd.f32 %v441_v6, %v367_v9 }
 0x301   :  { %v374_v12 = vadd.f32 %v443_v8, %v373_v10 }
 0x302   :  { %v369_v13 = vrot.slane %v368_v11, 2 }
 0x303   :  { %v375_v14 = vrot.slane %v374_v12, 2 }
 0x304   :  { %v370_v15 = vadd.f32 %v369_v13, %v368_v11 }
 0x305   :  { %v376_v16 = vadd.f32 %v375_v14, %v374_v12 }
 0x306   :  { %v371_v17 = vrot.slane %v370_v15, 1 }
 0x307   :  { %v377_v18 = vrot.slane %v376_v16, 1 }
 0x308   :  { %v372_v19 = vadd.f32 %v371_v17, %v370_v15 }
 0x309   :  { %v378_v20 = vadd.f32 %v377_v18, %v376_v16 }
 0x30a   :  { %444 = vrcp.f32 %v372_v19 }
 0x30b   :  { %446 = vrcp.f32 %v378_v20 }
 0x314   :  { %v445_v21 = vpop.eup %444 }
 0x315   :  { %v447_v22 = vpop.eup %446  ;;  %v380_v23 = vmul.f32 %v445_v21, %v441_v6 }
 0x316   :  { %v382_v24 = vmul.f32 %v447_v22, %v443_v8 }
 0x317   :  { %383 = vst [vmem:[#allocation2] sm:$0xff] %v380_v23 }
 0x318   :  { %384 = vst [vmem:[#allocation2 + $0x8] sm:$0xff] %v382_v24 }
 0x319   :  { %459 = shalt.err (!%p456_p4)
}
 0x31a   :  { %s460_s11 = scalar_lea.hbm %s687_s7, 256 }
 0x31b   :  { %p461_p5 = scmp.ne.s32.totalorder %s687_s7, %s460_s11  ;;  %p464_p6 = scmp.lt.u32.totalorder %s460_s11, %s687_s7 }
 0x31d   :  { %p466_p7 = pnand %p464_p6, %p461_p5 }
 0x31f   :  { %469 = shalt.err (!%p466_p7)
}
 0x320   :  { %394 = dma.vmem_to_hbm [thread:$0]  %s392_s30, 256, %s687_s7, [#allocation3]  }
 0x321   :  { %470 = dma.done.wait [#allocation3], 256  }
 0x322   :  { %471 = vsyncadd [#allocation3], 4294967040 }
 0x323   :  { %398 = vsyncpa [#allocation3], 1 }

</bundles_post_ra>
